<compile_context>
chip_gen: v7x
topology: tpu7x:2x2x1
jax: 0.10.0
libtpu: 0.0.40
codegen_flags: <defaults>
</compile_context>

<pallas_src>
import jax
import jax.numpy as jnp
from jax.experimental import pallas as pl
from jax.experimental.pallas import tpu as pltpu

D_IN = 784         # 28*28, fixed by the module
D1 = 200           # hidden width (default d1=200)
D1_PAD = 256       # lane-dense padded hidden width
D_OUT = 10         # number of classes
D_OUT_PAD = 128    # lane-dense padded fc2 width
NEG_BIG = -1e30    # bias for pad columns -> exp(.) == 0 after max-subtract


def _round_up(n, m):
    return ((n + m - 1) // m) * m


def _mlp_kernel(x_ref, w1_ref, b1_ref, w2_ref, b2_ref, o_ref):
    # in-kernel f32 -> bf16 cast (VPU, hidden under the MXU); no wrapper pass.
    x = x_ref[...].astype(jnp.bfloat16)
    # fc1: (TB, 784) bf16 @ (784, 256) bf16 -> f32 accumulation on the MXU
    h = jnp.dot(x, w1_ref[...], preferred_element_type=jnp.float32)
    h = h + b1_ref[...]
    # sigmoid via a single EUP push (tanh) instead of exp + reciprocal
    h = 0.5 * (jnp.tanh(0.5 * h) + 1.0)
    # fc2: (TB, 256) bf16 @ (256, 128) bf16 -> f32 accumulation
    logits = jnp.dot(h.astype(jnp.bfloat16), w2_ref[...],
                     preferred_element_type=jnp.float32)
    logits = logits + b2_ref[...]
    # numerically stable softmax over the 128 padded lanes (pad cols -> exp == 0)
    m = jnp.max(logits, axis=1, keepdims=True)
    e = jnp.exp(logits - m)
    denom = jnp.sum(e, axis=1, keepdims=True)
    # exact f32 division: probabilities sum to 1 to f32 precision
    o_ref[...] = (e / denom).astype(o_ref.dtype)


def net_forward(x_nchw, w1, b1, w2, b2, *, block_b=2048):
    """Forward pass of `Net`.

    x_nchw: (B, 1, 28, 28) float32
    w1:     (784, 200)  -- fc1.weight.T
    b1:     (200,)      -- fc1.bias
    w2:     (200, 10)   -- fc2.weight.T
    b2:     (10,)       -- fc2.bias
    returns (B, 10) softmax probabilities (float32)
    """
    B = x_nchw.shape[0]
    x = x_nchw.reshape(B, -1).astype(jnp.float32)          # nn.Flatten semantics

    # --- batch tiling -------------------------------------------------------
    # Multiple of 8 sublanes; when the whole (padded) batch would fit in a
    # single tile, split it into >=2 tiles so both v7x TensorCores get work
    # (no-op on v5e/v6e single-TC chips).
    block_b = _round_up(max(block_b, 8), 8)
    Bp8 = _round_up(B, 8)
    if Bp8 <= block_b:
        TB = _round_up(pl.cdiv(Bp8, 2), 8) if Bp8 >= 16 else Bp8
    else:
        TB = block_b
    Bp = _round_up(B, TB)
    if Bp != B:
        x = jnp.pad(x, ((0, Bp - B), (0, 0)))

    # --- weight prep (done once; tiny) --------------------------------------
    # Hidden width padded 200 -> 256: zero-pad w1 columns / b1, and zero-pad the
    # matching w2 rows (pad h columns become sigmoid(0)=0.5 but multiply zero
    # w2 rows, so logits are unchanged).
    w1_pad = jnp.zeros((D_IN, D1_PAD), jnp.float32).at[:, :D1].set(w1.astype(jnp.float32))
    b1_pad = jnp.zeros((1, D1_PAD), jnp.float32).at[0, :D1].set(b1.astype(jnp.float32))
    w2_pad = jnp.zeros((D1_PAD, D_OUT_PAD), jnp.float32).at[:D1, :D_OUT].set(w2.astype(jnp.float32))
    b2_pad = jnp.full((1, D_OUT_PAD), NEG_BIG, jnp.float32).at[0, :D_OUT].set(b2.astype(jnp.float32))
    w1_bf = w1_pad.astype(jnp.bfloat16)
    w2_bf = w2_pad.astype(jnp.bfloat16)

    out = pl.pallas_call(
        _mlp_kernel,
        out_shape=jax.ShapeDtypeStruct((Bp, D_OUT_PAD), jnp.float32),
        grid=(Bp // TB,),
        in_specs=[
            pl.BlockSpec((TB, D_IN), lambda i: (i, 0)),            # x: streamed f32 per batch tile
            pl.BlockSpec((D_IN, D1_PAD), lambda i: (0, 0)),        # w1: VMEM-resident
            pl.BlockSpec((1, D1_PAD), lambda i: (0, 0)),           # b1
            pl.BlockSpec((D1_PAD, D_OUT_PAD), lambda i: (0, 0)),   # w2
            pl.BlockSpec((1, D_OUT_PAD), lambda i: (0, 0)),        # b2
        ],
        out_specs=pl.BlockSpec((TB, D_OUT_PAD), lambda i: (i, 0)),
        compiler_params=pltpu.CompilerParams(
            dimension_semantics=("parallel",),                     # v7x dual-TC sharding
            vmem_limit_bytes=32 * 1024 * 1024,                     # TB=2048 uses ~16 MiB double-buffered
        ),
    )(x, w1_bf, b1_pad, w2_bf, b2_pad)

    return out[:B, :D_OUT]


def init_params(key):
    """Deterministic init mimicking PyTorch nn.Linear default (U[-1/sqrt(fan_in), 1/sqrt(fan_in)])."""
    k1, k2, k3, k4 = jax.random.split(key, 4)
    bound1 = 1.0 / (D_IN ** 0.5)
    bound2 = 1.0 / (D1 ** 0.5)
    w1 = jax.random.uniform(k1, (D_IN, D1), jnp.float32, -bound1, bound1)
    b1 = jax.random.uniform(k2, (D1,), jnp.float32, -bound1, bound1)
    w2 = jax.random.uniform(k3, (D1, D_OUT), jnp.float32, -bound2, bound2)
    b2 = jax.random.uniform(k4, (D_OUT,), jnp.float32, -bound2, bound2)
    return w1, b1, w2, b2


def _reference(x_nchw, w1, b1, w2, b2):
    """Pure-JAX f32 reference of the PyTorch forward."""
    x = x_nchw.reshape(x_nchw.shape[0], -1).astype(jnp.float32)
    h = jax.nn.sigmoid(x @ w1 + b1)
    logits = h @ w2 + b2
    return jax.nn.softmax(logits, axis=1)


if __name__ == "__main__":
    key = jax.random.PRNGKey(0)
    k_x, k_p = jax.random.split(key)
    batch = 2
    x = jax.random.normal(k_x, (batch, 1, 28, 28), jnp.float32)  # NCHW, like MNIST
    w1, b1, w2, b2 = init_params(k_p)

    out = net_forward(x, w1, b1, w2, b2)
    out = jax.block_until_ready(out)

    # sanity: shape, probabilities sum to 1 (exact f32 division),
    # and agreement with the f32 reference (bf16-streaming tolerance).
    assert out.shape == (batch, 10)
    assert jnp.allclose(jnp.sum(out, axis=1), 1.0, atol=1e-4)
    ref = _reference(x, w1, b1, w2, b2)
    assert jnp.allclose(out, ref, atol=2e-2)
    print("KERNEL_OK")
</pallas_src>

<mosaic_0001>
module attributes {stable_mosaic.version = 11 : i64} {
  func.func @_mlp_kernel(%arg0: i32, %arg1: memref<8x784xf32, #tpu.memory_space<vmem>>, %arg2: memref<784x256xbf16, #tpu.memory_space<vmem>>, %arg3: memref<1x256xf32, #tpu.memory_space<vmem>>, %arg4: memref<256x128xbf16, #tpu.memory_space<vmem>>, %arg5: memref<1x128xf32, #tpu.memory_space<vmem>>, %arg6: memref<8x128xf32, #tpu.memory_space<vmem>>) attributes {dimension_semantics = [#tpu.dimension_semantics<parallel>], iteration_bounds = array<i64: 1>, scalar_prefetch = 0 : i64, scratch_operands = 0 : i64, tpu.core_type = #tpu.core_type<tc>, window_params = [{transform_indices = @transform_0, window_bounds = array<i64: 8, 784>}, {pipeline_mode = #tpu.pipeline_mode<synchronous>, transform_indices = @transform_1, window_bounds = array<i64: 784, 256>}, {pipeline_mode = #tpu.pipeline_mode<synchronous>, transform_indices = @transform_2, window_bounds = array<i64: 1, 256>}, {pipeline_mode = #tpu.pipeline_mode<synchronous>, transform_indices = @transform_3, window_bounds = array<i64: 256, 128>}, {pipeline_mode = #tpu.pipeline_mode<synchronous>, transform_indices = @transform_4, window_bounds = array<i64: 1, 128>}, {transform_indices = @transform_5, window_bounds = array<i64: 8, 128>}]} {
    %c0 = arith.constant 0 : index
    %c0_0 = arith.constant 0 : index
    %0 = vector.load %arg1[%c0, %c0_0] : memref<8x784xf32, #tpu.memory_space<vmem>>, vector<8x784xf32>
    %1 = arith.truncf %0 : vector<8x784xf32> to vector<8x784xbf16>
    %c0_1 = arith.constant 0 : index
    %c0_2 = arith.constant 0 : index
    %2 = vector.load %arg2[%c0_1, %c0_2] : memref<784x256xbf16, #tpu.memory_space<vmem>>, vector<784x256xbf16>
    %cst = arith.constant dense<0.000000e+00> : vector<8x256xf32>
    %3 = tpu.matmul %1, %2, %cst {dimension_numbers = #tpu.dot_dimension_numbers<[1], [0], [0], [1], [0, 0, 1, 1], [], []>} : vector<8x784xbf16>, vector<784x256xbf16>, vector<8x256xf32> -> vector<8x256xf32>
    %c0_3 = arith.constant 0 : index
    %c0_4 = arith.constant 0 : index
    %4 = vector.load %arg3[%c0_3, %c0_4] : memref<1x256xf32, #tpu.memory_space<vmem>>, vector<1x256xf32>
    %5 = vector.broadcast %4 : vector<1x256xf32> to vector<8x256xf32>
    %6 = arith.addf %3, %5 : vector<8x256xf32>
    %cst_5 = arith.constant 5.000000e-01 : f32
    %7 = vector.broadcast %cst_5 : f32 to vector<8x256xf32>
    %8 = arith.mulf %7, %6 : vector<8x256xf32>
    %9 = math.tanh %8 : vector<8x256xf32>
    %cst_6 = arith.constant 1.000000e+00 : f32
    %10 = vector.broadcast %cst_6 : f32 to vector<8x256xf32>
    %11 = arith.addf %9, %10 : vector<8x256xf32>
    %cst_7 = arith.constant 5.000000e-01 : f32
    %12 = vector.broadcast %cst_7 : f32 to vector<8x256xf32>
    %13 = arith.mulf %12, %11 : vector<8x256xf32>
    %14 = arith.truncf %13 : vector<8x256xf32> to vector<8x256xbf16>
    %c0_8 = arith.constant 0 : index
    %c0_9 = arith.constant 0 : index
    %15 = vector.load %arg4[%c0_8, %c0_9] : memref<256x128xbf16, #tpu.memory_space<vmem>>, vector<256x128xbf16>
    %cst_10 = arith.constant dense<0.000000e+00> : vector<8x128xf32>
    %16 = tpu.matmul %14, %15, %cst_10 {dimension_numbers = #tpu.dot_dimension_numbers<[1], [0], [0], [1], [0, 0, 1, 1], [], []>} : vector<8x256xbf16>, vector<256x128xbf16>, vector<8x128xf32> -> vector<8x128xf32>
    %c0_11 = arith.constant 0 : index
    %c0_12 = arith.constant 0 : index
    %17 = vector.load %arg5[%c0_11, %c0_12] : memref<1x128xf32, #tpu.memory_space<vmem>>, vector<1x128xf32>
    %18 = vector.broadcast %17 : vector<1x128xf32> to vector<8x128xf32>
    %19 = arith.addf %16, %18 : vector<8x128xf32>
    %cst_13 = arith.constant dense<0xFF800000> : vector<8xf32>
    %20 = vector.multi_reduction <maximumf>, %19, %cst_13 [1] : vector<8x128xf32> to vector<8xf32>
    %21 = vector.shape_cast %20 : vector<8xf32> to vector<8x1xf32>
    %22 = vector.broadcast %21 : vector<8x1xf32> to vector<8x128xf32>
    %23 = arith.subf %19, %22 : vector<8x128xf32>
    %24 = math.exp %23 : vector<8x128xf32>
    %cst_14 = arith.constant dense<0.000000e+00> : vector<8xf32>
    %25 = vector.multi_reduction <add>, %24, %cst_14 [1] : vector<8x128xf32> to vector<8xf32>
    %26 = vector.shape_cast %25 : vector<8xf32> to vector<8x1xf32>
    %27 = vector.broadcast %26 : vector<8x1xf32> to vector<8x128xf32>
    %28 = arith.divf %24, %27 : vector<8x128xf32>
    %c0_15 = arith.constant 0 : index
    %c0_16 = arith.constant 0 : index
    %29 = vector.load %arg6[%c0_15, %c0_16] : memref<8x128xf32, #tpu.memory_space<vmem>>, vector<8x128xf32>
    tpu.vector_store %arg6[%c0_15, %c0_16], %28 {strides = array<i32>} : memref<8x128xf32, #tpu.memory_space<vmem>>, vector<8x128xf32>,
    return
  }
  func.func @transform_0(%arg0: i32) -> (i32, i32) {
    %c0_i32 = arith.constant 0 : i32
    %c0_i32_0 = arith.constant 0 : i32
    return %arg0, %c0_i32 : i32, i32
  }
  func.func @transform_1(%arg0: i32) -> (i32, i32) {
    %c0_i32 = arith.constant 0 : i32
    %c0_i32_0 = arith.constant 0 : i32
    %c0_i32_1 = arith.constant 0 : i32
    return %c0_i32, %c0_i32_0 : i32, i32
  }
  func.func @transform_2(%arg0: i32) -> (i32, i32) {
    %c0_i32 = arith.constant 0 : i32
    %c0_i32_0 = arith.constant 0 : i32
    %c0_i32_1 = arith.constant 0 : i32
    return %c0_i32, %c0_i32_0 : i32, i32
  }
  func.func @transform_3(%arg0: i32) -> (i32, i32) {
    %c0_i32 = arith.constant 0 : i32
    %c0_i32_0 = arith.constant 0 : i32
    %c0_i32_1 = arith.constant 0 : i32
    return %c0_i32, %c0_i32_0 : i32, i32
  }
  func.func @transform_4(%arg0: i32) -> (i32, i32) {
    %c0_i32 = arith.constant 0 : i32
    %c0_i32_0 = arith.constant 0 : i32
    %c0_i32_1 = arith.constant 0 : i32
    return %c0_i32, %c0_i32_0 : i32, i32
  }
  func.func @transform_5(%arg0: i32) -> (i32, i32) {
    %c0_i32 = arith.constant 0 : i32
    %c0_i32_0 = arith.constant 0 : i32
    return %arg0, %c0_i32 : i32, i32
  }
}

</mosaic_0001>

<bundles_post_ra>
// kernel: tpu_custom_call.1
= control target key start
LH: loop header
LB: loop body
LE: loop exit
PB: predicated region body
PF: predicated region fallthrough
CT: control target
= control target key end

     0   :  { %10 = vsyncpa [#allocation3], 0  ;;  %s1569_s0 = inlined_call_operand.hbm [shape: f32[8,784], index: 0, kind: input, shape index: {}]   ;;  %s1570_s1 = inlined_call_operand.hbm [shape: bf16[784,256], index: 1, kind: input, shape index: {}]   ;;  %s1571_s2 = inlined_call_operand.vmem [shape: f32[1,256], index: 2, kind: input, shape index: {}]   ;;  %s1572_s3 = inlined_call_operand.hbm [shape: bf16[256,128], index: 3, kind: input, shape index: {}]   ;;  %s1573_s4 = inlined_call_operand.vmem [shape: f32[1,128], index: 4, kind: input, shape index: {}]   ;;  %s1574_s5 = inlined_call_operand.hbm [shape: f32[8,128], index: 5, kind: output, shape index: {}]  }
   0x1   :  { %11 = vsyncpa [#allocation6], 0 }
   0x2   :  { %12 = vsyncpa [#allocation4], 0  ;;  %s1476_s18 = smov [#allocation5]   ;;  %s1382_s22 = scalar_lea.hbm %s1570_s1, 12544 }
   0x3   :  { %s28_s19 = sshll.u32 %s1476_s18, 4  ;;  %p1383_p0 = scmp.ne.s32.totalorder %s1570_s1, %s1382_s22  ;;  %s29_s19 = int_to_ptr.vmem [resolvable:$true] %s28_s19 }
   0x4   :  { %p1386_p1 = scmp.lt.u32.totalorder %s1382_s22, %s1570_s1 }
   0x6   :  { %p1388_p2 = pnand %p1386_p1, %p1383_p0 }
   0x8   :  { %1391 = shalt.err (!%p1388_p2)
}
   0x9   :  { %s1392_s27 = scalar_lea.vmem %s29_s19, 12544  ;;  %p1397_p4 = scmp.lt.s32.totalorder %s29_s19, %s29_s19 }
   0xa   :  { %p1393_p3 = scmp.ne.s32.totalorder %s29_s19, %s1392_s27  ;;  %p1398_p5 = scmp.lt.s32.totalorder %s1392_s27, %s1392_s27 }
   0xc   :  { %p1399_p6 = por %p1398_p5, %p1397_p4 }
   0xe   :  { %p1400_p7 = pnand %p1399_p6, %p1393_p3 }
  0x10   :  { %1403 = shalt.err (!%p1400_p7)
}
  0x11   :  { %s1477_s28 = smov 128   ;;  %s1478_s29 = smov 8  }
  0x12   :  { %34 = dma.hbm_to_vmem [thread:$0]  %s1570_s1, 12544, %s29_s19, [#allocation6], %s1477_s28, %s1477_s28, %s1478_s29  }
  0x13   :  { %s1479_s7 = smov [#allocation2]   ;;  %s1480_s9 = smov [#allocation7]  }
  0x14   :  { %s19_s8 = sshll.u32 %s1479_s7, 4  ;;  %s42_s10 = sshll.u32 %s1480_s9, 4  ;;  %s20_s8 = int_to_ptr.vmem [resolvable:$true] %s19_s8  ;;  %s43_s10 = int_to_ptr.vmem [resolvable:$true] %s42_s10 }
  0x15   :  { %s1404_s13 = scalar_lea.hbm %s1569_s0, 896 }
  0x16   :  { %p1405_p8 = scmp.ne.s32.totalorder %s1569_s0, %s1404_s13  ;;  %p1408_p9 = scmp.lt.u32.totalorder %s1404_s13, %s1569_s0 }
  0x18   :  { %p1410_p10 = pnand %p1408_p9, %p1405_p8 }
  0x1a   :  { %1413 = shalt.err (!%p1410_p10)
}
  0x1b   :  { %s1414_s1 = scalar_lea.vmem %s20_s8, 896  ;;  %p1419_p12 = scmp.lt.s32.totalorder %s20_s8, %s20_s8 }
  0x1c   :  { %p1415_p11 = scmp.ne.s32.totalorder %s20_s8, %s1414_s1  ;;  %p1420_p13 = scmp.lt.s32.totalorder %s1414_s1, %s1414_s1 }
  0x1e   :  { %p1421_p0 = por %p1420_p13, %p1419_p12 }
  0x20   :  { %p1422_p1 = pnand %p1421_p0, %p1415_p11 }
  0x22   :  { %1425 = shalt.err (!%p1422_p1)
}
  0x23   :  { %22 = dma.hbm_to_vmem [thread:$0]  %s1569_s0, 896, %s20_s8, [#allocation3]  }
  0x24   :  { %s1426_s22 = scalar_lea.hbm %s1572_s3, 2048 }
  0x25   :  { %p1427_p2 = scmp.ne.s32.totalorder %s1572_s3, %s1426_s22  ;;  %p1430_p3 = scmp.lt.u32.totalorder %s1426_s22, %s1572_s3 }
  0x27   :  { %p1432_p4 = pnand %p1430_p3, %p1427_p2 }
  0x29   :  { %1435 = shalt.err (!%p1432_p4)
}
  0x2a   :  { %s1436_s27 = scalar_lea.vmem %s43_s10, 2048  ;;  %p1441_p6 = scmp.lt.s32.totalorder %s43_s10, %s43_s10 }
  0x2b   :  { %p1437_p5 = scmp.ne.s32.totalorder %s43_s10, %s1436_s27  ;;  %p1442_p7 = scmp.lt.s32.totalorder %s1436_s27, %s1436_s27 }
  0x2d   :  { %p1443_p8 = por %p1442_p7, %p1441_p6 }
  0x2f   :  { %p1444_p9 = pnand %p1443_p8, %p1437_p5 }
  0x31   :  { %1447 = shalt.err (!%p1444_p9)
}
  0x32   :  { %s1481_s0 = smov 64   ;;  %s1482_s28 = smov 4  }
  0x33   :  { %48 = dma.hbm_to_vmem [thread:$0]  %s1572_s3, 2048, %s43_s10, [#allocation6], %s1481_s0, %s1481_s0, %s1482_s28  }
  0x34   :  { %1470 = dma.done.wait [#allocation3], 896  }
  0x35   :  { %1471 = vsyncadd [#allocation3], 4294966400 }
  0x36   :  { %1472 = dma.done.wait [#allocation6], 14592  }
  0x37   :  { %1473 = vsyncadd [#allocation6], 4294952704  ;;  %v1211_v0 = vld [vmem:[#allocation5 + $0x104] ss:$8 sps:$4 sm:$0xff]   ;;  %v1213_v1 = vld [vmem:[#allocation5 + $0x100] ss:$8 sps:$4 sm:$0xff]  }
  0x38   :  { %720 = vmatprep.subr.bf16.mxu0 %v1211_v0  ;;  %v1214_v2 = vld [vmem:[#allocation5 + $0x114] ss:$8 sps:$4 sm:$0xff]   ;;  %v1216_v3 = vld [vmem:[#allocation5 + $0x110] ss:$8 sps:$4 sm:$0xff]   ;;  %v1217_v4 = vld [vmem:[#allocation5 + $0x124] ss:$8 sps:$4 sm:$0xff]  }
  0x39   :  { %721 = vmatpush1.bf16.msra.mxu0 %v1213_v1  ;;  %v1219_v5 = vld [vmem:[#allocation5 + $0x120] ss:$8 sps:$4 sm:$0xff]   ;;  %v1220_v6 = vld [vmem:[#allocation5 + $0x134] ss:$8 sps:$4 sm:$0xff]   ;;  %v1222_v7 = vld [vmem:[#allocation5 + $0x130] ss:$8 sps:$4 sm:$0xff]  }
  0x3a   :  { %722 = vmatprep.subr.bf16.mxu0 %v1214_v2  ;;  %v1223_v8 = vld [vmem:[#allocation5 + $0x144] ss:$8 sps:$4 sm:$0xff]   ;;  %v1225_v9 = vld [vmem:[#allocation5 + $0x140] ss:$8 sps:$4 sm:$0xff]   ;;  %v1226_v10 = vld [vmem:[#allocation5 + $0x154] ss:$8 sps:$4 sm:$0xff]  }
  0x3b   :  { %v1228_v11 = vld [vmem:[#allocation5 + $0x150] ss:$8 sps:$4 sm:$0xff]   ;;  %v1253_v12 = vld [vmem:[#allocation5 + $0x4] ss:$8 sps:$4 sm:$0xff]   ;;  %v1255_v13 = vld [vmem:[#allocation5] ss:$8 sps:$4 sm:$0xff]  }
  0x3c   :  { %v1229_v14 = vld [vmem:[#allocation5 + $0x164] ss:$8 sps:$4 sm:$0xff]   ;;  %679 = vmatprep.subr.bf16.mxu1 %v1253_v12  ;;  %v1259_v15 = vld [vmem:[#allocation5 + $0x14] ss:$8 sps:$4 sm:$0xff]   ;;  %v1261_v16 = vld [vmem:[#allocation5 + $0x10] ss:$8 sps:$4 sm:$0xff]  }
  0x3d   :  { %723 = vmatpush1.bf16.msra.mxu0 %v1216_v3  ;;  %680 = vmatpush1.bf16.msra.mxu1 %v1255_v13  ;;  %v1231_v17 = vld [vmem:[#allocation5 + $0x160] ss:$8 sps:$4 sm:$0xff]   ;;  %v1232_v18 = vld [vmem:[#allocation5 + $0x174] ss:$8 sps:$4 sm:$0xff]   ;;  %v1265_v19 = vld [vmem:[#allocation5 + $0x24] ss:$8 sps:$4 sm:$0xff]  }
  0x3e   :  { %724 = vmatprep.subr.bf16.mxu0 %v1217_v4  ;;  %681 = vmatprep.subr.bf16.mxu1 %v1259_v15  ;;  %v64_v20 = vld [vmem:[#allocation2 + $0x18] sm:$0xff]  ;;  %v1234_v23 = vld [vmem:[#allocation5 + $0x170] ss:$8 sps:$4 sm:$0xff]   ;;  %v1271_v25 = vld [vmem:[#allocation5 + $0x34] ss:$8 sps:$4 sm:$0xff]   ;;  %vm675_vm0 = vcmask 130048  }
  0x3f   :  { %v1267_v21 = vld [vmem:[#allocation5 + $0x20] ss:$8 sps:$4 sm:$0xff]   ;;  %v71_v22 = vpack.c.bf16 %v64_v20, %v64_v20  ;;  %v1235_v24 = vld [vmem:[#allocation5 + $0x184] ss:$8 sps:$4 sm:$0xff]   ;;  %v1273_v27 = vld [vmem:[#allocation5 + $0x30] ss:$8 sps:$4 sm:$0xff]  }
  0x40   :  { %v1237_v26 = vld [vmem:[#allocation5 + $0x180] ss:$8 sps:$4 sm:$0xff]   ;;  %v1277_v28 = vld [vmem:[#allocation5 + $0x44] ss:$8 sps:$4 sm:$0xff]   ;;  %v1238_v29 = vld [vmem:[#allocation5 + $0x194] ss:$8 sps:$4 sm:$0xff]  }
  0x41   :  { %725 = vmatpush1.bf16.msra.mxu0 %v1219_v5  ;;  %682 = vmatpush1.bf16.msra.mxu1 %v1261_v16  ;;  %v1240_v30 = vld [vmem:[#allocation5 + $0x190] ss:$8 sps:$4 sm:$0xff]   ;;  %v1279_v31 = vld [vmem:[#allocation5 + $0x40] ss:$8 sps:$4 sm:$0xff]   ;;  %v1283_v32 = vld [vmem:[#allocation5 + $0x54] ss:$8 sps:$4 sm:$0xff]  }
  0x42   :  { %726 = vmatprep.subr.bf16.mxu0 %v1220_v6  ;;  %683 = vmatprep.subr.bf16.mxu1 %v1265_v19  ;;  %v1241_v33 = vld [vmem:[#allocation5 + $0x1a4] ss:$8 sps:$4 sm:$0xff]   ;;  %v1243_v34 = vld [vmem:[#allocation5 + $0x1a0] ss:$8 sps:$4 sm:$0xff]   ;;  %v1285_v35 = vld [vmem:[#allocation5 + $0x50] ss:$8 sps:$4 sm:$0xff]  }
  0x43   :  { %752 = vmatprep.mubr.bf16.mxu0 %v71_v22  ;;  %v1289_v36 = vld [vmem:[#allocation5 + $0x64] ss:$8 sps:$4 sm:$0xff]   ;;  %v1244_v37 = vld [vmem:[#allocation5 + $0x1b4] ss:$8 sps:$4 sm:$0xff]   ;;  %v1246_v38 = vld [vmem:[#allocation5 + $0x1b0] ss:$8 sps:$4 sm:$0xff]  }
  0x44   :  { %v1291_v39 = vld [vmem:[#allocation5 + $0x60] ss:$8 sps:$4 sm:$0xff]   ;;  %v1295_v40 = vld [vmem:[#allocation5 + $0x74] ss:$8 sps:$4 sm:$0xff]   ;;  %v1247_v41 = vld [vmem:[#allocation5 + $0x1c4] ss:$8 sps:$4 sm:$0xff]  }
  0x45   :  { %727 = vmatpush1.bf16.msra.mxu0 %v1222_v7  ;;  %684 = vmatpush1.bf16.msra.mxu1 %v1267_v21  ;;  %v1249_v42 = vld [vmem:[#allocation5 + $0x1c0] ss:$8 sps:$4 sm:$0xff]   ;;  %v1297_v43 = vld [vmem:[#allocation5 + $0x70] ss:$8 sps:$4 sm:$0xff]   ;;  %v1301_v44 = vld [vmem:[#allocation5 + $0x84] ss:$8 sps:$4 sm:$0xff]  }
  0x46   :  { %728 = vmatprep.subr.bf16.mxu0 %v1223_v8  ;;  %685 = vmatprep.subr.bf16.mxu1 %v1271_v25  ;;  %v1250_v45 = vld [vmem:[#allocation5 + $0x1d4] ss:$8 sps:$4 sm:$0xff]   ;;  %v1252_v46 = vld [vmem:[#allocation5 + $0x1d0] ss:$8 sps:$4 sm:$0xff]   ;;  %v1303_v47 = vld [vmem:[#allocation5 + $0x80] ss:$8 sps:$4 sm:$0xff]  }
  0x47   :  { %v1307_v48 = vld [vmem:[#allocation5 + $0x94] ss:$8 sps:$4 sm:$0xff]   ;;  %v1256_v49 = vld [vmem:[#allocation5 + $0x1e4] ss:$8 sps:$4 sm:$0xff]   ;;  %v1258_v50 = vld [vmem:[#allocation5 + $0x1e0] ss:$8 sps:$4 sm:$0xff]  }
  0x48   :  { %v1309_v51 = vld [vmem:[#allocation5 + $0x90] ss:$8 sps:$4 sm:$0xff]   ;;  %v1313_v52 = vld [vmem:[#allocation5 + $0xa4] ss:$8 sps:$4 sm:$0xff]   ;;  %v1262_v53 = vld [vmem:[#allocation5 + $0x1f4] ss:$8 sps:$4 sm:$0xff]  }
  0x49   :  { %729 = vmatpush1.bf16.msra.mxu0 %v1225_v9  ;;  %686 = vmatpush1.bf16.msra.mxu1 %v1273_v27  ;;  %v1264_v54 = vld [vmem:[#allocation5 + $0x1f0] ss:$8 sps:$4 sm:$0xff]   ;;  %v1315_v56 = vld [vmem:[#allocation5 + $0xa0] ss:$8 sps:$4 sm:$0xff]   ;;  %v1319_v57 = vld [vmem:[#allocation5 + $0xb4] ss:$8 sps:$4 sm:$0xff]  }
  0x4a   :  { %730 = vmatprep.subr.bf16.mxu0 %v1226_v10  ;;  %687 = vmatprep.subr.bf16.mxu1 %v1277_v28  ;;  %v63_v55 = vld [vmem:[#allocation2 + $0x10] sm:$0xff]  ;;  %v1270_v58 = vld [vmem:[#allocation5 + $0x204] ss:$8 sps:$4 sm:$0xff]   ;;  %v62_v61 = vld [vmem:[#allocation2 + $0x8] sm:$0xff]  ;;  %v1483_v25 = vmov 0   ;;  %s1484_s8 = smov [#allocation8]  }
  0x4b   :  { %v70_v59 = vpack.c.bf16 %v63_v55, %v63_v55  ;;  %v1321_v60 = vld [vmem:[#allocation5 + $0xb0] ss:$8 sps:$4 sm:$0xff]   ;;  %v1268_v62 = vld [vmem:[#allocation5 + $0x200] ss:$8 sps:$4 sm:$0xff]   ;;  %v1325_v63 = vld [vmem:[#allocation5 + $0xc4] ss:$8 sps:$4 sm:$0xff]   ;;  %v69_v0 = vpack.c.bf16 %v62_v61, %v62_v61 }
  0x4c   :  { %v1276_v1 = vld [vmem:[#allocation5 + $0x214] ss:$8 sps:$4 sm:$0xff]   ;;  %v1327_v2 = vld [vmem:[#allocation5 + $0xc0] ss:$8 sps:$4 sm:$0xff]   ;;  %v1274_v4 = vld [vmem:[#allocation5 + $0x210] ss:$8 sps:$4 sm:$0xff]  }
  0x4d   :  { %731 = vmatpush1.bf16.msra.mxu0 %v1228_v11  ;;  %688 = vmatpush1.bf16.msra.mxu1 %v1279_v31  ;;  %v66_v3 = vld [vmem:[#allocation2 + $0x28] sm:$0xff]  ;;  %v1282_v5 = vld [vmem:[#allocation5 + $0x224] ss:$8 sps:$4 sm:$0xff]   ;;  %v1280_v9 = vld [vmem:[#allocation5 + $0x220] ss:$8 sps:$4 sm:$0xff]   ;;  %s1044_s9 = sshll.u32 %s1484_s8, 4  ;;  %s1045_s9 = int_to_ptr.vmem [resolvable:$true] %s1044_s9 }
  0x4e   :  { %732 = vmatprep.subr.bf16.mxu0 %v1229_v14  ;;  %689 = vmatprep.subr.bf16.mxu1 %v1283_v32  ;;  %v1331_v6 = vld [vmem:[#allocation5 + $0xd4] ss:$8 sps:$4 sm:$0xff]   ;;  %v73_v7 = vpack.c.bf16 %v66_v3, %v66_v3  ;;  %v1333_v8 = vld [vmem:[#allocation5 + $0xd0] ss:$8 sps:$4 sm:$0xff]   ;;  %v1337_v10 = vld [vmem:[#allocation5 + $0xe4] ss:$8 sps:$4 sm:$0xff]   ;;  %p1453_p11 = scmp.lt.s32.totalorder %s1045_s9, %s1045_s9 }
  0x4f   :  { %711 = vmatprep.mubr.bf16.mxu1 %v69_v0  ;;  %v1288_v11 = vld [vmem:[#allocation5 + $0x234] ss:$8 sps:$4 sm:$0xff]   ;;  %v1339_v12 = vld [vmem:[#allocation5 + $0xe0] ss:$8 sps:$4 sm:$0xff]   ;;  %v1286_v13 = vld [vmem:[#allocation5 + $0x230] ss:$8 sps:$4 sm:$0xff]  }
  0x50   :  { %v1343_v14 = vld [vmem:[#allocation5 + $0xf4] ss:$8 sps:$4 sm:$0xff]   ;;  %v1294_v15 = vld [vmem:[#allocation5 + $0x244] ss:$8 sps:$4 sm:$0xff]   ;;  %v1345_v16 = vld [vmem:[#allocation5 + $0xf0] ss:$8 sps:$4 sm:$0xff]  }
  0x51   :  { %733 = vmatpush1.bf16.msra.mxu0 %v1231_v17  ;;  %690 = vmatpush1.bf16.msra.mxu1 %v1285_v35  ;;  %v61_v17 = vld [vmem:[#allocation2] sm:$0xff]  ;;  %v1300_v20 = vld [vmem:[#allocation5 + $0x254] ss:$8 sps:$4 sm:$0xff]   ;;  %v1370_v61 = vld [vmem:[#allocation7 + $0x70] sm:$0xff]  }
  0x52   :  { %734 = vmatprep.subr.bf16.mxu0 %v1232_v18  ;;  %691 = vmatprep.subr.bf16.mxu1 %v1289_v36  ;;  %v1292_v18 = vld [vmem:[#allocation5 + $0x240] ss:$8 sps:$4 sm:$0xff]   ;;  %v1354_v19 = vld [vmem:[#allocation5 + $0x304] ss:$8 sps:$4 sm:$0xff]   ;;  %v68_v21 = vpack.c.bf16 %v61_v17, %v61_v17  ;;  %v1312_v28 = vld [vmem:[#allocation5 + $0x274] ss:$8 sps:$4 sm:$0xff]  }
  0x53   :  { %v1352_v22 = vld [vmem:[#allocation5 + $0x300] ss:$8 sps:$4 sm:$0xff]   ;;  %v1318_v31 = vld [vmem:[#allocation5 + $0x284] ss:$8 sps:$4 sm:$0xff]  }
  0x54   :  { %v1304_v27 = vld [vmem:[#allocation5 + $0x260] ss:$8 sps:$4 sm:$0xff]   ;;  %v1330_v35 = vld [vmem:[#allocation5 + $0x2a4] ss:$8 sps:$4 sm:$0xff]  }
  0x55   :  { %735 = vmatpush1.bf16.msra.mxu0 %v1234_v23  ;;  %692 = vmatpush1.bf16.msra.mxu1 %v1291_v39  ;;  %v1298_v23 = vld [vmem:[#allocation5 + $0x250] ss:$8 sps:$4 sm:$0xff]   ;;  %v1316_v32 = vld [vmem:[#allocation5 + $0x280] ss:$8 sps:$4 sm:$0xff]   ;;  %v1342_v39 = vld [vmem:[#allocation5 + $0x2c4] ss:$8 sps:$4 sm:$0xff]  }
  0x56   :  { %736 = vmatprep.subr.bf16.mxu0 %v1235_v24  ;;  %693 = vmatprep.subr.bf16.mxu1 %v1295_v40  ;;  %v1306_v24 = vld [vmem:[#allocation5 + $0x264] ss:$8 sps:$4 sm:$0xff]   ;;  %v1328_v36 = vld [vmem:[#allocation5 + $0x2a0] ss:$8 sps:$4 sm:$0xff]  }
  0x57   :  { %v1340_v40 = vld [vmem:[#allocation5 + $0x2c0] ss:$8 sps:$4 sm:$0xff]  }
  0x58   :  { %v1364_v55 = vld [vmem:[#allocation7 + $0x58] sm:$0xff]  }
  0x59   :  { %737 = vmatpush1.bf16.msra.mxu0 %v1237_v26  ;;  %694 = vmatpush1.bf16.msra.mxu1 %v1297_v43  ;;  %v67_v26 = vld [vmem:[#allocation2 + $0x30] sm:$0xff]  ;;  %v1351_v43 = vld [vmem:[#allocation5 + $0x2e4] ss:$8 sps:$4 sm:$0xff]  }
  0x5a   :  { %738 = vmatprep.subr.bf16.mxu0 %v1238_v29  ;;  %695 = vmatprep.subr.bf16.mxu1 %v1301_v44  ;;  %v74_v29 = vpack.c.bf16 %v67_v26, %v67_v26  ;;  %v1349_v44 = vld [vmem:[#allocation5 + $0x2e0] ss:$8 sps:$4 sm:$0xff]  }
  0x5b   :  { %v1373_v0 = vld [vmem:[#allocation7 + $0x38] sm:$0xff]  }
  0x5d   :  { %739 = vmatpush1.bf16.msra.mxu0 %v1240_v30  ;;  %696 = vmatpush1.bf16.msra.mxu1 %v1303_v47  ;;  %v1310_v30 = vld [vmem:[#allocation5 + $0x270] ss:$8 sps:$4 sm:$0xff]   ;;  %v65_v47 = vld [vmem:[#allocation2 + $0x20] sm:$0xff] }
  0x5e   :  { %740 = vmatprep.subr.bf16.mxu0 %v1241_v33  ;;  %697 = vmatprep.subr.bf16.mxu1 %v1307_v48  ;;  %v1324_v33 = vld [vmem:[#allocation5 + $0x294] ss:$8 sps:$4 sm:$0xff]   ;;  %v72_v48 = vpack.c.bf16 %v65_v47, %v65_v47 }
  0x61   :  { %741 = vmatpush1.bf16.msra.mxu0 %v1243_v34  ;;  %698 = vmatpush1.bf16.msra.mxu1 %v1309_v51  ;;  %v1322_v34 = vld [vmem:[#allocation5 + $0x290] ss:$8 sps:$4 sm:$0xff]  }
  0x62   :  { %742 = vmatprep.subr.bf16.mxu0 %v1244_v37  ;;  %699 = vmatprep.subr.bf16.mxu1 %v1313_v52  ;;  %v1336_v37 = vld [vmem:[#allocation5 + $0x2b4] ss:$8 sps:$4 sm:$0xff]  }
  0x63   :  { %v1360_v51 = vld [vmem:[#allocation7 + $0x48] sm:$0xff]  }
  0x64   :  { %v1361_v52 = vld [vmem:[#allocation7 + $0x8] sm:$0xff]  }
  0x65   :  { %743 = vmatpush1.bf16.msra.mxu0 %v1246_v38  ;;  %700 = vmatpush1.bf16.msra.mxu1 %v1315_v56  ;;  %v1334_v38 = vld [vmem:[#allocation5 + $0x2b0] ss:$8 sps:$4 sm:$0xff]   ;;  %v1365_v56 = vld [vmem:[#allocation7 + $0x18] sm:$0xff]  }
  0x66   :  { %744 = vmatprep.subr.bf16.mxu0 %v1247_v41  ;;  %701 = vmatprep.subr.bf16.mxu1 %v1319_v57  ;;  %v1348_v41 = vld [vmem:[#allocation5 + $0x2d4] ss:$8 sps:$4 sm:$0xff]  }
  0x67   :  { %v1366_v57 = vld [vmem:[#allocation7 + $0x60] sm:$0xff]  }
  0x69   :  { %745 = vmatpush1.bf16.msra.mxu0 %v1249_v42  ;;  %702 = vmatpush1.bf16.msra.mxu1 %v1321_v60  ;;  %v1346_v42 = vld [vmem:[#allocation5 + $0x2d0] ss:$8 sps:$4 sm:$0xff]  }
  0x6a   :  { %746 = vmatprep.subr.bf16.mxu0 %v1250_v45  ;;  %703 = vmatprep.subr.bf16.mxu1 %v1325_v63  ;;  %v1357_v45 = vld [vmem:[#allocation5 + $0x2f4] ss:$8 sps:$4 sm:$0xff]   ;;  %v1372_v63 = vld [vmem:[#allocation7 + $0x78] sm:$0xff]  }
  0x6b   :  { %v1369_v60 = vld [vmem:[#allocation7 + $0x28] sm:$0xff]  }
  0x6d   :  { %747 = vmatpush1.bf16.msra.mxu0 %v1252_v46  ;;  %704 = vmatpush1.bf16.msra.mxu1 %v1327_v2  ;;  %v1355_v46 = vld [vmem:[#allocation5 + $0x2f0] ss:$8 sps:$4 sm:$0xff]  }
  0x6e   :  { %748 = vmatprep.subr.bf16.mxu0 %v1256_v49  ;;  %705 = vmatprep.subr.bf16.mxu1 %v1331_v6  ;;  %v1358_v49 = vld [vmem:[#allocation7 + $0x40] sm:$0xff]  }
  0x71   :  { %749 = vmatpush1.bf16.msra.mxu0 %v1258_v50  ;;  %706 = vmatpush1.bf16.msra.mxu1 %v1333_v8  ;;  %v1359_v50 = vld [vmem:[#allocation7] sm:$0xff]  }
  0x72   :  { %750 = vmatprep.subr.bf16.mxu0 %v1262_v53  ;;  %707 = vmatprep.subr.bf16.mxu1 %v1337_v10  ;;  %v1362_v53 = vld [vmem:[#allocation7 + $0x50] sm:$0xff]  }
  0x75   :  { %751 = vmatpush1.bf16.msra.mxu0 %v1264_v54  ;;  %708 = vmatpush1.bf16.msra.mxu1 %v1339_v12  ;;  %v1363_v54 = vld [vmem:[#allocation7 + $0x10] sm:$0xff]   ;;  %v173_v12 = vld [vmem:[%s1571_s2] sm:$0x3] }
  0x76   :  { %761 = vmatprep.subr.bf16.mxu0 %v1270_v58  ;;  %709 = vmatprep.subr.bf16.mxu1 %v1343_v14  ;;  %v1367_v58 = vld [vmem:[#allocation7 + $0x20] sm:$0xff]  }
  0x78   :  { %753 = vmatmul.mubr.bf16.vlgmr.msra.gmra.mrb[0].mxu0 %v70_v59  ;;  %v1368_v59 = vld [vmem:[#allocation7 + $0x68] sm:$0xff]  }
  0x79   :  { %762 = vmatpush1.bf16.msra.mxu0 %v1268_v62  ;;  %793 = vmatprep.mubr.bf16.mxu0 %v73_v7  ;;  %v1371_v62 = vld [vmem:[#allocation7 + $0x30] sm:$0xff]  }
  0x7a   :  { %763 = vmatprep.subr.bf16.mxu0 %v1276_v1  ;;  %710 = vmatpush1.bf16.msra.mxu1 %v1345_v16 }
  0x7b   :  { %802 = vmatprep.subr.bf16.mxu1 %v1354_v19 }
  0x7d   :  { %764 = vmatpush1.bf16.msra.mxu0 %v1274_v4  ;;  %712 = vmatmul.mubr.bf16.vlgmr.msra.gmra.mrb[0].mxu1 %v68_v21 }
  0x7e   :  { %765 = vmatprep.subr.bf16.mxu0 %v1282_v5  ;;  %803 = vmatpush1.bf16.msra.mxu1 %v1352_v22 }
  0x7f   :  { %834 = vmatprep.mubr.bf16.mxu1 %v1483_v25  ;;  %1170 = vmatprep.subr.bf16.mxu1 %v1358_v49 }
  0x81   :  { %766 = vmatpush1.bf16.msra.mxu0 %v1280_v9  ;;  %v175_v9 = vlaneseq }
  0x82   :  { %767 = vmatprep.subr.bf16.mxu0 %v1288_v11 }
  0x83   :  { %v176_v10 = vshrl.u32 %v175_v9, 7 }
  0x85   :  { %768 = vmatpush1.bf16.msra.mxu0 %v1286_v13  ;;  %1152 = vmatmul.mubr.msk.bf16.vlgmr.msra.gmra.mrb[4].mxu1 %vm675_vm0, %v74_v29  ;;  %v177_v11 = vsub.s32 0, %v176_v10  ;;  %v181_v13 = vsub.s32 1, %v176_v10 }
  0x86   :  { %769 = vmatprep.subr.bf16.mxu0 %v1294_v15  ;;  %1171 = vmatpush3.bf16.msra.mxu1 %v1359_v50 }
  0x87   :  { %1172 = vmatprep.subr.bf16.mxu1 %v1360_v51  ;;  %v178_v14 = vrot.slane %v173_v12, %v177_v11  ;;  %v182_v15 = vrot.slane %v173_v12, %v181_v13 }
  0x89   :  { %770 = vmatpush1.bf16.msra.mxu0 %v1292_v18 }
  0x8a   :  { %771 = vmatprep.subr.bf16.mxu0 %v1300_v20  ;;  %1173 = vmatpush3.bf16.msra.mxu1 %v1361_v52 }
  0x8b   :  { %1174 = vmatprep.subr.bf16.mxu1 %v1362_v53 }
  0x8d   :  { %772 = vmatpush1.bf16.msra.mxu0 %v1298_v23 }
  0x8e   :  { %773 = vmatprep.subr.bf16.mxu0 %v1306_v24  ;;  %1175 = vmatpush3.bf16.msra.mxu1 %v1363_v54 }
  0x8f   :  { %1176 = vmatprep.subr.bf16.mxu1 %v1364_v55 }
  0x91   :  { %774 = vmatpush1.bf16.msra.mxu0 %v1304_v27 }
  0x92   :  { %775 = vmatprep.subr.bf16.mxu0 %v1312_v28  ;;  %1177 = vmatpush3.bf16.msra.mxu1 %v1365_v56 }
  0x93   :  { %1178 = vmatprep.subr.bf16.mxu1 %v1366_v57 }
  0x95   :  { %776 = vmatpush1.bf16.msra.mxu0 %v1310_v30 }
  0x96   :  { %777 = vmatprep.subr.bf16.mxu0 %v1318_v31  ;;  %1179 = vmatpush3.bf16.msra.mxu1 %v1367_v58 }
  0x97   :  { %1180 = vmatprep.subr.bf16.mxu1 %v1368_v59 }
  0x99   :  { %778 = vmatpush1.bf16.msra.mxu0 %v1316_v32 }
  0x9a   :  { %779 = vmatprep.subr.bf16.mxu0 %v1324_v33  ;;  %1181 = vmatpush3.bf16.msra.mxu1 %v1369_v60 }
  0x9b   :  { %1182 = vmatprep.subr.bf16.mxu1 %v1370_v61 }
  0x9d   :  { %780 = vmatpush1.bf16.msra.mxu0 %v1322_v34 }
  0x9e   :  { %781 = vmatprep.subr.bf16.mxu0 %v1330_v35  ;;  %1183 = vmatpush3.bf16.msra.mxu1 %v1371_v62 }
  0x9f   :  { %1184 = vmatprep.subr.bf16.mxu1 %v1372_v63 }
  0xa1   :  { %782 = vmatpush1.bf16.msra.mxu0 %v1328_v36 }
  0xa2   :  { %783 = vmatprep.subr.bf16.mxu0 %v1336_v37  ;;  %1185 = vmatpush3.bf16.msra.mxu1 %v1373_v0 }
  0xa5   :  { %784 = vmatpush1.bf16.msra.mxu0 %v1334_v38  ;;  %v1153_v38 = vld [vmem:[%s1573_s4] ss:$0 sm:$0xff]  ;;  %s1448_s4 = scalar_lea.vmem %s1045_s9, 128 }
  0xa6   :  { %785 = vmatprep.subr.bf16.mxu0 %v1342_v39  ;;  %p1449_p10 = scmp.ne.s32.totalorder %s1045_s9, %s1448_s4  ;;  %p1454_p12 = scmp.lt.s32.totalorder %s1448_s4, %s1448_s4 }
  0xa8   :  { %p1455_p13 = por %p1454_p12, %p1453_p11 }
  0xa9   :  { %786 = vmatpush1.bf16.msra.mxu0 %v1340_v40 }
  0xaa   :  { %787 = vmatprep.subr.bf16.mxu0 %v1348_v41  ;;  %p1456_p0 = pnand %p1455_p13, %p1449_p10 }
  0xad   :  { %788 = vmatpush1.bf16.msra.mxu0 %v1346_v42 }
  0xae   :  { %789 = vmatprep.subr.bf16.mxu0 %v1351_v43 }
  0xb1   :  { %790 = vmatpush1.bf16.msra.mxu0 %v1349_v44 }
  0xb2   :  { %791 = vmatprep.subr.bf16.mxu0 %v1357_v45 }
  0xb5   :  { %792 = vmatpush1.bf16.msra.mxu0 %v1355_v46 }
  0xb8   :  { %794 = vmatmul.mubr.bf16.vlgmr.msra.gmra.mrb[0].mxu0 %v72_v48 }
 0x150   :  { %v713_v1 = vpop.f32.mrb[0].mxu1 }
 0x151   :  { %v715_v2 = vpop.f32.mrb[1].mxu1  ;;  %v714_v16 = vadd.f32 %v713_v1, %v178_v14 }
 0x152   :  { %v717_v3 = vpop.f32.mrb[2].mxu1  ;;  %v716_v17 = vadd.f32 %v715_v2, %v182_v15 }
 0x153   :  { %v718_v4 = vpop.f32.mrb[3].mxu1 }
 0x158   :  { %v836_v5 = vpop.f32.mrb[4].mxu1 }
 0x159   :  { %v838_v6 = vpop.f32.mrb[5].mxu1 }
 0x15a   :  { %v840_v7 = vpop.f32.mrb[6].mxu1 }
 0x15b   :  { %v841_v8 = vpop.f32.mrb[7].mxu1 }
 0x18b   :  { %v795_v18 = vpop.f32.mrb[0].mxu0 }
 0x18c   :  { %v1193_v19 = vadd.f32 %v795_v18, %v714_v16  ;;  %v797_v20 = vpop.f32.mrb[1].mxu0 }
 0x18d   :  { %v1196_v21 = vadd.f32 %v797_v20, %v716_v17  ;;  %v799_v22 = vpop.f32.mrb[2].mxu0 }
 0x18e   :  { %v1194_v23 = vadd.f32 %v1193_v19, %v836_v5  ;;  %v800_v24 = vpop.f32.mrb[3].mxu0 }
 0x18f   :  { %v1197_v25 = vadd.f32 %v1196_v21, %v838_v6 }
 0x190   :  { %v843_v26 = vmul.f32 0.5, %v1194_v23 }
 0x191   :  { %v844_v27 = vmul.f32 0.5, %v1197_v25 }
 0x192   :  { %1374 = vtanh.f32 %v843_v26 }
 0x193   :  { %1376 = vtanh.f32 %v844_v27 }
 0x19c   :  { %v1375_v28 = vpop.eup %1374 }
 0x19d   :  { %v1377_v29 = vpop.eup %1376  ;;  %v847_v30 = vadd.f32 1.0, %v1375_v28 }
 0x19e   :  { %v848_v31 = vadd.f32 1.0, %v1377_v29 }
 0x19f   :  { %v849_v32 = vmul.f32 0.5, %v847_v30 }
 0x1a0   :  { %v850_v33 = vmul.f32 0.5, %v848_v31 }
 0x1a1   :  { %v851_v35 = vpack.c.bf16 %v849_v32, %v849_v32 }
 0x1a2   :  { %v852_v34 = vpack.c.bf16 %v850_v33, %v850_v33 }
 0x1a4   :  { %1020 = vmatprep.mubr.bf16.mxu1 %v852_v34 }
 0x1a5   :  { %1021 = vmatmul.mubr.bf16.vlgmr.msra.gmra.mrb[8].mxu1 %v851_v35 }
 0x278   :  { %v1186_v36 = vpop.f32.mrb[8].mxu1 }
 0x279   :  { %v1187_v37 = vpop.f32.mrb[9].mxu1 }
 0x27a   :  { %v1188_v39 = vadd.f32 %v1187_v37, %v1186_v36  ;;  %v1189_v40 = vpop.f32.mrb[10].mxu1 }
 0x27b   :  { %v1190_v41 = vpop.f32.mrb[11].mxu1 }
 0x27c   :  { %v1023_v42 = vadd.f32 %v1188_v39, %v1153_v38 }
 0x27e   :  { %1028 = vmax.xlane.f32.xlu0 %v1023_v42 }
 0x30b   :  { %v1029_v43 = vpop.xlane.xlu0 %1028 }
 0x30c   :  { %v1030_v44 = vsub.f32 %v1023_v42, %v1029_v43 }
 0x30e   :  { %v1031_v45 = vmul.f32 1.442695, %v1030_v44 }
 0x310   :  { %1378 = vpow2.f32 %v1031_v45 }
 0x31a   :  { %v1379_v46 = vpop.eup %1378 }
 0x31b   :  { %1033 = vadd.xlane.f32.xlu0 %v1379_v46 }
 0x3a8   :  { %v1034_v47 = vpop.xlane.xlu0 %1033 }
 0x3a9   :  { %1380 = vrcp.f32 %v1034_v47 }
 0x3b3   :  { %v1381_v48 = vpop.eup %1380 }
 0x3b4   :  { %v1036_v49 = vmul.f32 %v1381_v48, %v1379_v46 }
 0x3b6   :  { %1037 = vst [vmem:[#allocation8] sm:$0xff] %v1036_v49 }
 0x3b7   :  { %1459 = shalt.err (!%p1456_p0)
}
 0x3b8   :  { %s1460_s12 = scalar_lea.hbm %s1574_s5, 128 }
 0x3b9   :  { %p1461_p1 = scmp.ne.s32.totalorder %s1574_s5, %s1460_s12  ;;  %p1464_p2 = scmp.lt.u32.totalorder %s1460_s12, %s1574_s5 }
 0x3bb   :  { %p1466_p3 = pnand %p1464_p2, %p1461_p1 }
 0x3bd   :  { %1469 = shalt.err (!%p1466_p3)
}
 0x3be   :  { %1047 = dma.vmem_to_hbm [thread:$0]  %s1045_s9, 128, %s1574_s5, [#allocation4]  }
 0x3bf   :  { %1474 = dma.done.wait [#allocation4], 128  }
 0x3c0   :  { %1475 = vsyncadd [#allocation4], 4294967168 }
 0x3c1   :  { %1051 = vsyncpa [#allocation3], 1 }
 0x3c2   :  { %1052 = vsyncpa [#allocation6], 1 }
 0x3c3   :  { %1053 = vsyncpa [#allocation4], 1 }

</bundles_post_ra>
